<compile_context>
chip_gen: v7x
topology: tpu7x:2x2x1
jax: 0.10.0
libtpu: 0.0.40
codegen_flags: <defaults>
</compile_context>

<pallas_src>
import functools

import jax
import jax.numpy as jnp
import numpy as np
from jax import lax
from jax.experimental import pallas as pl
from jax.experimental.pallas import tpu as pltpu

COS_EPS = 1e-8                     # F.cosine_similarity norm clamp
_VMEM_BUDGET = 40 * 1024 * 1024    # working-set target (shrinks tile if exceeded)
_VMEM_LIMIT = 48 * 1024 * 1024     # explicit scoped-VMEM limit (< v7x 64 MiB physical)


def _round_up(x, m):
    return (x + m - 1) // m * m


def _choose_tile(batch):
    if batch <= 128:
        return 128
    # >= 2 row blocks so both v7x TensorCores get work; cap at 512 so bf16 input
    # double-buffers + (tile,tile) f32 temporaries stay comfortably inside VMEM
    # on every generation (v6e could go larger, but 512/bf16 already clears its
    # HBM-roofline knee).
    return min(512, _round_up((batch + 1) // 2, 128))


def _vmem_estimate(tile, dp):
    inputs = 2 * 2 * tile * dp * 2        # 2 operands, double-buffered, bf16
    temps = 3 * tile * tile * 4           # logits / exp / pos f32 tiles
    scratch = 2 * tile * 128 * 4          # lane-dense accumulators
    return inputs + temps + scratch


def _supcon_kernel(x_row_ref, x_col_ref, lab_row_ref, lab_col_ref, npos_ref,
                   out_ref, denom_acc, poslog_acc,
                   *, batch, inv_temp, tile, mask_cols):
    i = pl.program_id(0)            # row block (parallel)
    j = pl.program_id(1)            # column block (reduction axis)

    @pl.when(j == 0)
    def _init():
        denom_acc[...] = jnp.zeros_like(denom_acc)
        poslog_acc[...] = jnp.zeros_like(poslog_acc)

    # Operands are already L2-normalized bf16; NT contraction -> logits on MXU,
    # f32 accumulation, then one scalar multiply by 1/temperature.
    logits = lax.dot_general(
        x_row_ref[...], x_col_ref[...],
        dimension_numbers=(((1,), (1,)), ((), ())),
        preferred_element_type=jnp.float32) * inv_temp          # (tile, tile) f32

    # Masks: off-diagonal always; padded-column mask only when padding exists.
    gr = i * tile + lax.broadcasted_iota(jnp.int32, (tile, 1), 0)
    gc = j * tile + lax.broadcasted_iota(jnp.int32, (1, tile), 1)
    off_diag = gr != gc
    if mask_cols:
        denom_mask = jnp.logical_and(off_diag, gc < batch)
    else:
        denom_mask = off_diag

    # |logits| <= ~1.02/T, so exp is safe in f32 (wrapper guards small T).
    exp_logits = jnp.where(denom_mask, jnp.exp(logits), 0.0)
    pos_mask = jnp.logical_and(lab_row_ref[...] == lab_col_ref[...], off_diag)
    pos_logits = jnp.where(pos_mask, logits, 0.0)

    # Lane-group folding: static 128-aligned slices are free vreg subsets, the
    # adds are pure VALU -> per-step accumulation never touches the XLU.
    d_part = exp_logits[:, 0:128]
    p_part = pos_logits[:, 0:128]
    for g in range(1, tile // 128):
        sl = slice(g * 128, (g + 1) * 128)
        d_part = d_part + exp_logits[:, sl]
        p_part = p_part + pos_logits[:, sl]
    denom_acc[...] += d_part
    poslog_acc[...] += p_part

    @pl.when(j == pl.num_programs(1) - 1)
    def _finalize():
        # Single cross-lane reduce + log, once per row block.
        denom = jnp.sum(denom_acc[...], axis=1, keepdims=True)     # (tile, 1)
        poslog = jnp.sum(poslog_acc[...], axis=1, keepdims=True)   # (tile, 1)
        npos = npos_ref[...]                                       # (tile, 1)
        # -sum_j pos_ij*log(prob_ij) = npos_i*log(denom_i) - sum_j pos_ij*logits_ij
        per_row = npos * jnp.log(denom) - poslog
        # npos==0 rows (incl. padded rows) must contribute exactly 0.
        out_ref[...] = jnp.where(npos > 0.0, per_row, 0.0)


def supcon_loss(embeddings, labels, temperature=0.07):
    """Supervised contrastive loss (forward) via a tiled Pallas TPU kernel."""
    B, D = embeddings.shape
    if 1.02 / float(temperature) > 80.0:
        # exp(cos/T) would approach f32 overflow (~exp(88)); the kernel skips
        # max-subtraction on purpose because normalized logits are bounded.
        raise ValueError("temperature too small for the no-max-subtraction path")

    dp = _round_up(D, 128)
    tile = _choose_tile(B)
    while tile > 128 and _vmem_estimate(tile, dp) > _VMEM_BUDGET:
        tile -= 128
    bp = _round_up(B, tile)

    # Wrapper-side normalization + bf16 cast + zero padding (one fused pass).
    x = embeddings.astype(jnp.float32)
    norm = jnp.sqrt(jnp.sum(x * x, axis=-1, keepdims=True))
    x_hat = (x / jnp.maximum(norm, COS_EPS)).astype(jnp.bfloat16)
    x_pad = jnp.zeros((bp, dp), jnp.bfloat16).at[:B, :D].set(x_hat)

    lab = labels.astype(jnp.int32)
    lab_rows = jnp.full((bp, 1), -1, jnp.int32).at[:B, 0].set(lab)
    lab_cols = jnp.full((1, bp), -1, jnp.int32).at[0, :B].set(lab)

    # npos is labels-only: compute once in the wrapper (padded rows get 0).
    npos = jnp.sum((lab[:, None] == lab[None, :]).astype(jnp.float32), axis=1) - 1.0
    npos_pad = jnp.zeros((bp, 1), jnp.float32).at[:B, 0].set(npos)

    grid = (bp // tile, bp // tile)
    kernel = functools.partial(
        _supcon_kernel, batch=B, inv_temp=float(1.0 / temperature),
        tile=tile, mask_cols=(bp != B))

    per_row_loss = pl.pallas_call(
        kernel,
        out_shape=jax.ShapeDtypeStruct((bp, 1), jnp.float32),
        grid_spec=pltpu.PrefetchScalarGridSpec(
            num_scalar_prefetch=0,
            grid=grid,
            in_specs=[
                pl.BlockSpec((tile, dp), lambda i, j: (i, 0)),   # row tile (resident over j)
                pl.BlockSpec((tile, dp), lambda i, j: (j, 0)),   # column tile (streamed)
                pl.BlockSpec((tile, 1), lambda i, j: (i, 0)),    # labels (rows)
                pl.BlockSpec((1, tile), lambda i, j: (0, j)),    # labels (cols)
                pl.BlockSpec((tile, 1), lambda i, j: (i, 0)),    # npos per row
            ],
            out_specs=pl.BlockSpec((tile, 1), lambda i, j: (i, 0)),
            scratch_shapes=[
                pltpu.VMEM((tile, 128), jnp.float32),   # denom accumulator (lane-dense)
                pltpu.VMEM((tile, 128), jnp.float32),   # positive-logit accumulator
            ]),
        compiler_params=pltpu.CompilerParams(
            dimension_semantics=("parallel", "arbitrary"),
            vmem_limit_bytes=_VMEM_LIMIT),
    )(x_pad, x_pad, lab_rows, lab_cols, npos_pad)

    # Tiny final reduction over per-row partials (padded / npos==0 rows are 0).
    return jnp.sum(per_row_loss) / B


# ---------------------------------------------------------------------------
# References for validation.
# ---------------------------------------------------------------------------
def supcon_ref_f64(embeddings, labels, temperature=0.07):
    """Exact mirror of the PyTorch forward, computed in float64 (numpy)."""
    x = np.asarray(embeddings, dtype=np.float64)
    lab = np.asarray(labels)
    B = x.shape[0]
    norm = np.maximum(np.linalg.norm(x, axis=-1, keepdims=True), 1e-8)
    cosine_sim = (x @ x.T) / (norm * norm.T) / temperature
    diag_mask = ~np.eye(B, dtype=bool)
    exp_logits = np.exp(cosine_sim) * diag_mask
    prob = exp_logits / exp_logits.sum(axis=1, keepdims=True)
    labels_eq = (lab[None, :] == lab[:, None]).astype(np.float64)
    loss = -(labels_eq * diag_mask) * np.log(prob + 1e-8)
    return float(loss.sum() / B)


def supcon_mirror_jax(embeddings, labels, temperature=0.07):
    """Pure-JAX mirror of the kernel algebra (same bf16 quantization, no +1e-8)."""
    x = embeddings.astype(jnp.float32)
    B = x.shape[0]
    norm = jnp.sqrt(jnp.sum(x * x, axis=-1, keepdims=True))
    xh = (x / jnp.maximum(norm, COS_EPS)).astype(jnp.bfloat16)
    logits = lax.dot_general(xh, xh, (((1,), (1,)), ((), ())),
                             preferred_element_type=jnp.float32) * (1.0 / temperature)
    off = ~jnp.eye(B, dtype=bool)
    denom = jnp.sum(jnp.where(off, jnp.exp(logits), 0.0), axis=1)
    pos = (labels[None, :] == labels[:, None]) & off
    npos = jnp.sum(pos.astype(jnp.float32), axis=1)
    poslog = jnp.sum(jnp.where(pos, logits, 0.0), axis=1)
    per_row = jnp.where(npos > 0, npos * jnp.log(denom) - poslog, 0.0)
    return jnp.sum(per_row) / B


if __name__ == "__main__":
    key = jax.random.PRNGKey(0)
    k_emb, k_lab = jax.random.split(key)

    B, D = 8, 32  # batch_size, feature_dim
    embeddings = jax.random.normal(k_emb, (B, D), dtype=jnp.float32)
    labels = jax.random.randint(k_lab, (B,), 0, 3, dtype=jnp.int32)

    loss = jax.block_until_ready(supcon_loss(embeddings, labels))

    # (1) Tight structural check against a pure-JAX mirror of the kernel math.
    mirror = jax.block_until_ready(supcon_mirror_jax(embeddings, labels))
    assert np.allclose(np.asarray(loss), np.asarray(mirror),
                       rtol=5e-3, atol=5e-3), (loss, mirror)

    # (2) Semantics check against the exact float64 PyTorch-equivalent reference.
    #     Tolerance covers bf16 MXU operands and the dropped +1e-8 inside log.
    ref = supcon_ref_f64(embeddings, labels)
    assert np.allclose(np.asarray(loss), ref, rtol=2e-2, atol=2e-2), (loss, ref)

    print("KERNEL_OK")
</pallas_src>

<mosaic_0001>
module attributes {stable_mosaic.version = 11 : i64} {
  func.func @_supcon_kernel(%arg0: i32, %arg1: i32, %arg2: memref<128x128xbf16, #tpu.memory_space<vmem>>, %arg3: memref<128x128xbf16, #tpu.memory_space<vmem>>, %arg4: memref<128x1xi32, #tpu.memory_space<vmem>>, %arg5: memref<1x128xi32, #tpu.memory_space<vmem>>, %arg6: memref<128x1xf32, #tpu.memory_space<vmem>>, %arg7: memref<128x1xf32, #tpu.memory_space<vmem>>, %arg8: memref<128x128xf32, #tpu.memory_space<vmem>>, %arg9: memref<128x128xf32, #tpu.memory_space<vmem>>) attributes {dimension_semantics = [#tpu.dimension_semantics<parallel>, #tpu.dimension_semantics<arbitrary>], iteration_bounds = array<i64: 1, 1>, scalar_prefetch = 0 : i64, scratch_operands = 2 : i64, tpu.core_type = #tpu.core_type<tc>, window_params = [{transform_indices = @transform_0, window_bounds = array<i64: 128, 128>}, {transform_indices = @transform_1, window_bounds = array<i64: 128, 128>}, {transform_indices = @transform_2, window_bounds = array<i64: 128, 1>}, {transform_indices = @transform_3, window_bounds = array<i64: 1, 128>}, {transform_indices = @transform_4, window_bounds = array<i64: 128, 1>}, {transform_indices = @transform_5, window_bounds = array<i64: 128, 1>}]} {
    %c0_i32 = arith.constant 0 : i32
    %0 = arith.cmpi eq, %arg1, %c0_i32 : i32
    %1 = arith.extui %0 : i1 to i32
    %c0_i32_0 = arith.constant 0 : i32
    %2 = arith.cmpi ne, %1, %c0_i32_0 : i32
    scf.if %2 {
      %cst_22 = arith.constant 0.000000e+00 : f32
      %43 = vector.broadcast %cst_22 : f32 to vector<128x128xf32>
      %c0_23 = arith.constant 0 : index
      %c0_24 = arith.constant 0 : index
      %44 = vector.load %arg8[%c0_23, %c0_24] : memref<128x128xf32, #tpu.memory_space<vmem>>, vector<128x128xf32>
      tpu.vector_store %arg8[%c0_23, %c0_24], %43 {strides = array<i32>} : memref<128x128xf32, #tpu.memory_space<vmem>>, vector<128x128xf32>,
      %cst_25 = arith.constant 0.000000e+00 : f32
      %45 = vector.broadcast %cst_25 : f32 to vector<128x128xf32>
      %c0_26 = arith.constant 0 : index
      %c0_27 = arith.constant 0 : index
      %46 = vector.load %arg9[%c0_26, %c0_27] : memref<128x128xf32, #tpu.memory_space<vmem>>, vector<128x128xf32>
      tpu.vector_store %arg9[%c0_26, %c0_27], %45 {strides = array<i32>} : memref<128x128xf32, #tpu.memory_space<vmem>>, vector<128x128xf32>,
    } else {
    }
    %c0 = arith.constant 0 : index
    %c0_1 = arith.constant 0 : index
    %3 = vector.load %arg2[%c0, %c0_1] : memref<128x128xbf16, #tpu.memory_space<vmem>>, vector<128x128xbf16>
    %c0_2 = arith.constant 0 : index
    %c0_3 = arith.constant 0 : index
    %4 = vector.load %arg3[%c0_2, %c0_3] : memref<128x128xbf16, #tpu.memory_space<vmem>>, vector<128x128xbf16>
    %cst = arith.constant dense<0.000000e+00> : vector<128x128xf32>
    %5 = tpu.matmul %3, %4, %cst {dimension_numbers = #tpu.dot_dimension_numbers<[1], [1], [0], [0], [0, 0, 1, 0], [], []>} : vector<128x128xbf16>, vector<128x128xbf16>, vector<128x128xf32> -> vector<128x128xf32>
    %cst_4 = arith.constant 14.2857141 : f32
    %6 = vector.broadcast %cst_4 : f32 to vector<128x128xf32>
    %7 = arith.mulf %5, %6 : vector<128x128xf32>
    %c128_i32 = arith.constant 128 : i32
    %8 = arith.muli %arg0, %c128_i32 : i32
    %9 = tpu.iota {dimensions = array<i32: 0>} : vector<128x1xi32>
    %10 = vector.broadcast %8 : i32 to vector<128x1xi32>
    %11 = arith.addi %10, %9 : vector<128x1xi32>
    %c128_i32_5 = arith.constant 128 : i32
    %12 = arith.muli %arg1, %c128_i32_5 : i32
    %13 = tpu.iota {dimensions = array<i32: 1>} : vector<1x128xi32>
    %14 = vector.broadcast %12 : i32 to vector<1x128xi32>
    %15 = arith.addi %14, %13 : vector<1x128xi32>
    %16 = vector.broadcast %11 : vector<128x1xi32> to vector<128x128xi32>
    %17 = vector.broadcast %15 : vector<1x128xi32> to vector<128x128xi32>
    %18 = arith.cmpi ne, %16, %17 : vector<128x128xi32>
    %c8_i32 = arith.constant 8 : i32
    %19 = vector.broadcast %c8_i32 : i32 to vector<1x128xi32>
    %20 = arith.cmpi slt, %15, %19 : vector<1x128xi32>
    %21 = vector.broadcast %20 : vector<1x128xi1> to vector<128x128xi1>
    %22 = arith.andi %18, %21 : vector<128x128xi1>
    %23 = math.exp %7 : vector<128x128xf32>
    %cst_6 = arith.constant 0.000000e+00 : f32
    %24 = vector.broadcast %cst_6 : f32 to vector<128x128xf32>
    %25 = arith.select %22, %23, %24 : vector<128x128xi1>, vector<128x128xf32>
    %c0_7 = arith.constant 0 : index
    %c0_8 = arith.constant 0 : index
    %26 = vector.load %arg4[%c0_7, %c0_8] : memref<128x1xi32, #tpu.memory_space<vmem>>, vector<128x1xi32>
    %c0_9 = arith.constant 0 : index
    %c0_10 = arith.constant 0 : index
    %27 = vector.load %arg5[%c0_9, %c0_10] : memref<1x128xi32, #tpu.memory_space<vmem>>, vector<1x128xi32>
    %28 = vector.broadcast %26 : vector<128x1xi32> to vector<128x128xi32>
    %29 = vector.broadcast %27 : vector<1x128xi32> to vector<128x128xi32>
    %30 = arith.cmpi eq, %28, %29 : vector<128x128xi32>
    %31 = arith.andi %30, %18 : vector<128x128xi1>
    %cst_11 = arith.constant 0.000000e+00 : f32
    %32 = vector.broadcast %cst_11 : f32 to vector<128x128xf32>
    %33 = arith.select %31, %7, %32 : vector<128x128xi1>, vector<128x128xf32>
    %c0_12 = arith.constant 0 : index
    %c0_13 = arith.constant 0 : index
    %34 = vector.load %arg8[%c0_12, %c0_13] : memref<128x128xf32, #tpu.memory_space<vmem>>, vector<128x128xf32>
    %35 = arith.addf %34, %25 : vector<128x128xf32>
    %c0_14 = arith.constant 0 : index
    %c0_15 = arith.constant 0 : index
    %36 = vector.load %arg8[%c0_14, %c0_15] : memref<128x128xf32, #tpu.memory_space<vmem>>, vector<128x128xf32>
    tpu.vector_store %arg8[%c0_14, %c0_15], %35 {strides = array<i32>} : memref<128x128xf32, #tpu.memory_space<vmem>>, vector<128x128xf32>,
    %c0_16 = arith.constant 0 : index
    %c0_17 = arith.constant 0 : index
    %37 = vector.load %arg9[%c0_16, %c0_17] : memref<128x128xf32, #tpu.memory_space<vmem>>, vector<128x128xf32>
    %38 = arith.addf %37, %33 : vector<128x128xf32>
    %c0_18 = arith.constant 0 : index
    %c0_19 = arith.constant 0 : index
    %39 = vector.load %arg9[%c0_18, %c0_19] : memref<128x128xf32, #tpu.memory_space<vmem>>, vector<128x128xf32>
    tpu.vector_store %arg9[%c0_18, %c0_19], %38 {strides = array<i32>} : memref<128x128xf32, #tpu.memory_space<vmem>>, vector<128x128xf32>,
    %c0_i32_20 = arith.constant 0 : i32
    %40 = arith.cmpi eq, %arg1, %c0_i32_20 : i32
    %41 = arith.extui %40 : i1 to i32
    %c0_i32_21 = arith.constant 0 : i32
    %42 = arith.cmpi ne, %41, %c0_i32_21 : i32
    scf.if %42 {
      %c0_22 = arith.constant 0 : index
      %c0_23 = arith.constant 0 : index
      %43 = vector.load %arg8[%c0_22, %c0_23] : memref<128x128xf32, #tpu.memory_space<vmem>>, vector<128x128xf32>
      %cst_24 = arith.constant dense<0.000000e+00> : vector<128xf32>
      %44 = vector.multi_reduction <add>, %43, %cst_24 [1] : vector<128x128xf32> to vector<128xf32>
      %45 = vector.shape_cast %44 : vector<128xf32> to vector<128x1xf32>
      %c0_25 = arith.constant 0 : index
      %c0_26 = arith.constant 0 : index
      %46 = vector.load %arg9[%c0_25, %c0_26] : memref<128x128xf32, #tpu.memory_space<vmem>>, vector<128x128xf32>
      %cst_27 = arith.constant dense<0.000000e+00> : vector<128xf32>
      %47 = vector.multi_reduction <add>, %46, %cst_27 [1] : vector<128x128xf32> to vector<128xf32>
      %48 = vector.shape_cast %47 : vector<128xf32> to vector<128x1xf32>
      %c0_28 = arith.constant 0 : index
      %c0_29 = arith.constant 0 : index
      %49 = vector.load %arg6[%c0_28, %c0_29] : memref<128x1xf32, #tpu.memory_space<vmem>>, vector<128x1xf32>
      %50 = math.log %45 : vector<128x1xf32>
      %51 = arith.mulf %49, %50 : vector<128x1xf32>
      %52 = arith.subf %51, %48 : vector<128x1xf32>
      %cst_30 = arith.constant 0.000000e+00 : f32
      %53 = vector.broadcast %cst_30 : f32 to vector<128x1xf32>
      %54 = arith.cmpf ogt, %49, %53 : vector<128x1xf32>
      %cst_31 = arith.constant 0.000000e+00 : f32
      %55 = vector.broadcast %cst_31 : f32 to vector<128x1xf32>
      %56 = arith.select %54, %52, %55 : vector<128x1xi1>, vector<128x1xf32>
      %c0_32 = arith.constant 0 : index
      %c0_33 = arith.constant 0 : index
      %57 = vector.load %arg7[%c0_32, %c0_33] : memref<128x1xf32, #tpu.memory_space<vmem>>, vector<128x1xf32>
      tpu.vector_store %arg7[%c0_32, %c0_33], %56 {strides = array<i32>} : memref<128x1xf32, #tpu.memory_space<vmem>>, vector<128x1xf32>,
    } else {
    }
    return
  }
  func.func @transform_0(%arg0: i32, %arg1: i32) -> (i32, i32) {
    %c0_i32 = arith.constant 0 : i32
    %c0_i32_0 = arith.constant 0 : i32
    return %arg0, %c0_i32 : i32, i32
  }
  func.func @transform_1(%arg0: i32, %arg1: i32) -> (i32, i32) {
    %c0_i32 = arith.constant 0 : i32
    %c0_i32_0 = arith.constant 0 : i32
    return %arg1, %c0_i32 : i32, i32
  }
  func.func @transform_2(%arg0: i32, %arg1: i32) -> (i32, i32) {
    %c0_i32 = arith.constant 0 : i32
    %c0_i32_0 = arith.constant 0 : i32
    return %arg0, %c0_i32 : i32, i32
  }
  func.func @transform_3(%arg0: i32, %arg1: i32) -> (i32, i32) {
    %c0_i32 = arith.constant 0 : i32
    %c0_i32_0 = arith.constant 0 : i32
    return %c0_i32, %arg1 : i32, i32
  }
  func.func @transform_4(%arg0: i32, %arg1: i32) -> (i32, i32) {
    %c0_i32 = arith.constant 0 : i32
    %c0_i32_0 = arith.constant 0 : i32
    return %arg0, %c0_i32 : i32, i32
  }
  func.func @transform_5(%arg0: i32, %arg1: i32) -> (i32, i32) {
    %c0_i32 = arith.constant 0 : i32
    %c0_i32_0 = arith.constant 0 : i32
    return %arg0, %c0_i32 : i32, i32
  }
}

</mosaic_0001>

<bundles_post_ra>
// kernel: tpu_custom_call.1
= control target key start
LH: loop header
LB: loop body
LE: loop exit
PB: predicated region body
PF: predicated region fallthrough
CT: control target
= control target key end

     0   :  { %v1030_v1 = vmov 0   ;;  %v299_v38 = vlaneseq  ;;  %s1653_s1 = inlined_call_operand.vmem [shape: bf16[128,128], index: 1, kind: input, shape index: {}]   ;;  %s1654_s0 = inlined_call_operand.vmem [shape: bf16[128,128], index: 0, kind: input, shape index: {}]   ;;  %s1655_s2 = inlined_call_operand.vmem [shape: s32[128,1], index: 2, kind: input, shape index: {}]   ;;  %s1656_s3 = inlined_call_operand.vmem [shape: s32[1,128], index: 3, kind: input, shape index: {}]   ;;  %s1657_s4 = inlined_call_operand.vmem [shape: f32[128,1], index: 4, kind: input, shape index: {}]   ;;  %s1658_s5 = inlined_call_operand.vmem [shape: f32[128,1], index: 5, kind: output, shape index: {}]  }
   0x1   :  { %v950_v0 = vld [vmem:[%s1653_s1] sm:$0xff]   ;;  %949 = vset.pattern.permute.xlu1 %v1030_v1  ;;  %948 = vset.pattern.permute.xlu0 %v1030_v1  ;;  %v951_v2 = vld [vmem:[%s1653_s1 + $0x8] sm:$0xff]   ;;  %v952_v3 = vld [vmem:[%s1653_s1 + $0x10] sm:$0xff]  }
   0x2   :  { %899 = vmatprep.subr.bf16.mxu0 %v950_v0  ;;  %931 = vmatprep.subr.bf16.mxu1 %v950_v0  ;;  %v958_v4 = vld [vmem:[%s1654_s0] sm:$0xff]   ;;  %v953_v6 = vld [vmem:[%s1653_s1 + $0x18] sm:$0xff]   ;;  %v423_v7 = vld [vmem:[%s1655_s2 + $0x10] sm:$0xff]  ;;  %v1163_v40 = vshrl.u32 %v299_v38, 7  ;;  %v1168_v43 = vand.u32 127, %v299_v38 }
   0x3   :  { %900 = vmatpush3.bf16.xpose.msra.mxu0 %v950_v0  ;;  %939 = vmatpush3.bf16.xpose.msra.mxu1 %v950_v0  ;;  %v959_v5 = vld [vmem:[%s1654_s0 + $0x20] sm:$0xff]   ;;  %v424_v9 = vld [vmem:[%s1655_s2 + $0x18] sm:$0xff]  ;;  %v422_v10 = vld [vmem:[%s1655_s2 + $0x8] sm:$0xff] }
   0x4   :  { %901 = vmatprep.subr.bf16.mxu0 %v951_v2  ;;  %932 = vmatprep.subr.bf16.mxu1 %v951_v2  ;;  %v421_v8 = vld [vmem:[%s1655_s2] sm:$0xff]  ;;  %v426_v11 = vld [vmem:[%s1655_s2 + $0x28] sm:$0xff]  ;;  %v428_v14 = vld [vmem:[%s1655_s2 + $0x38] sm:$0xff]  ;;  %v1166_v42 = vadd.s32 16, %v1163_v40  ;;  %v1176_v45 = vadd.s32 24, %v1163_v40  ;;  %v1186_v50 = vadd.s32 8, %v1163_v40  ;;  %vm338_vm7 = vcmp.ne.s32.totalorder %v1163_v40, %v1168_v43 }
   0x5   :  { %915 = vmatprep.mubr.bf16.mxu0 %v958_v4  ;;  %923 = vmatprep.mubr.bf16.mxu1 %v959_v5  ;;  %v425_v12 = vld [vmem:[%s1655_s2 + $0x20] sm:$0xff]  ;;  %v427_v15 = vld [vmem:[%s1655_s2 + $0x30] sm:$0xff]  ;;  %v430_v16 = vld [vmem:[%s1655_s2 + $0x48] sm:$0xff]  ;;  %v1221_v63 = vadd.s32 48, %v1163_v40 }
   0x6   :  { %445 = vperm.xlu1 %949, %v423_v7   ;;  %439 = vperm.xlu0 %948, %v421_v8   ;;  %v954_v13 = vld [vmem:[%s1653_s1 + $0x20] sm:$0xff]   ;;  %v955_v18 = vld [vmem:[%s1653_s1 + $0x28] sm:$0xff]   ;;  %v432_v19 = vld [vmem:[%s1655_s2 + $0x58] sm:$0xff]  ;;  %vm340_vm1 = vcmp.ne.s32.totalorder %v1166_v42, %v1168_v43  ;;  %vm341_vm3 = vcmp.ne.s32.totalorder %v1176_v45, %v1168_v43  ;;  %vm339_vm9 = vcmp.ne.s32.totalorder %v1186_v50, %v1168_v43  ;;  %v1238_v8 = vadd.s32 56, %v1163_v40 }
   0x7   :  { %v429_v17 = vld [vmem:[%s1655_s2 + $0x40] sm:$0xff]  ;;  %v431_v20 = vld [vmem:[%s1655_s2 + $0x50] sm:$0xff]  ;;  %v434_v21 = vld [vmem:[%s1655_s2 + $0x68] sm:$0xff]  ;;  %vm1659_vm12 = vcmp.ne.s32.totalorder %v1221_v63, %v1168_v43 }
   0x8   :  { %v433_v22 = vld [vmem:[%s1655_s2 + $0x60] sm:$0xff]  ;;  %v956_v23 = vld [vmem:[%s1653_s1 + $0x30] sm:$0xff]   ;;  %v436_v24 = vld [vmem:[%s1655_s2 + $0x78] sm:$0xff]  ;;  %vm345_vm14 = vcmp.ne.s32.totalorder %v1238_v8, %v1168_v43 }
   0x9   :  { %v435_v25 = vld [vmem:[%s1655_s2 + $0x70] sm:$0xff]  ;;  %v957_v26 = vld [vmem:[%s1653_s1 + $0x38] sm:$0xff]   ;;  %v960_v27 = vld [vmem:[%s1654_s0 + $0x8] sm:$0xff]  }
   0xa   :  { %448 = vperm.xlu1 %949, %v424_v9   ;;  %442 = vperm.xlu0 %948, %v422_v10   ;;  %v961_v28 = vld [vmem:[%s1654_s0 + $0x28] sm:$0xff]   ;;  %v962_v29 = vld [vmem:[%s1654_s0 + $0x10] sm:$0xff]   ;;  %v964_v31 = vld [vmem:[%s1654_s0 + $0x18] sm:$0xff]  }
   0xb   :  { %902 = vmatpush3.bf16.xpose.msra.mxu0 %v951_v2  ;;  %940 = vmatpush3.bf16.xpose.msra.mxu1 %v951_v2  ;;  %v963_v30 = vld [vmem:[%s1654_s0 + $0x30] sm:$0xff]   ;;  %v965_v32 = vld [vmem:[%s1654_s0 + $0x38] sm:$0xff]   ;;  %v1173_v44 = vld [vmem:[%s1656_s3] ss:$0 sm:$0xff] }
   0xc   :  { %903 = vmatprep.subr.bf16.mxu0 %v952_v3  ;;  %933 = vmatprep.subr.bf16.mxu1 %v952_v3  ;;  %v734_v45 = vld [vmem:[%s1657_s4 + $0x8] sm:$0xff] }
   0xe   :  { %454 = vperm.xlu1 %949, %v426_v11   ;;  %451 = vperm.xlu0 %948, %v425_v12   ;;  %v1250_v11 = vadd.s32 40, %v1163_v40 }
  0x12   :  { %460 = vperm.xlu1 %949, %v428_v14   ;;  %457 = vperm.xlu0 %948, %v427_v15   ;;  %v1255_v14 = vadd.s32 32, %v1163_v40  ;;  %v1258_v15 = vadd.s32 80, %v1163_v40 }
  0x13   :  { %904 = vmatpush3.bf16.xpose.msra.mxu0 %v952_v3  ;;  %941 = vmatpush3.bf16.xpose.msra.mxu1 %v952_v3 }
  0x14   :  { %905 = vmatprep.subr.bf16.mxu0 %v953_v6  ;;  %934 = vmatprep.subr.bf16.mxu1 %v953_v6 }
  0x16   :  { %466 = vperm.xlu1 %949, %v430_v16   ;;  %463 = vperm.xlu0 %948, %v429_v17   ;;  %v1261_v16 = vadd.s32 120, %v1163_v40 }
  0x1a   :  { %472 = vperm.xlu1 %949, %v432_v19   ;;  %469 = vperm.xlu0 %948, %v431_v20  }
  0x1b   :  { %906 = vmatpush3.bf16.xpose.msra.mxu0 %v953_v6  ;;  %942 = vmatpush3.bf16.xpose.msra.mxu1 %v953_v6 }
  0x1c   :  { %907 = vmatprep.subr.bf16.mxu0 %v954_v13  ;;  %935 = vmatprep.subr.bf16.mxu1 %v954_v13 }
  0x1e   :  { %478 = vperm.xlu1 %949, %v434_v21   ;;  %475 = vperm.xlu0 %948, %v433_v22  }
  0x22   :  { %484 = vperm.xlu1 %949, %v436_v24   ;;  %481 = vperm.xlu0 %948, %v435_v25  }
  0x23   :  { %908 = vmatpush3.bf16.xpose.msra.mxu0 %v954_v13  ;;  %943 = vmatpush3.bf16.xpose.msra.mxu1 %v954_v13 }
  0x24   :  { %909 = vmatprep.subr.bf16.mxu0 %v955_v18  ;;  %936 = vmatprep.subr.bf16.mxu1 %v955_v18 }
  0x2b   :  { %910 = vmatpush3.bf16.xpose.msra.mxu0 %v955_v18  ;;  %944 = vmatpush3.bf16.xpose.msra.mxu1 %v955_v18 }
  0x2c   :  { %911 = vmatprep.subr.bf16.mxu0 %v956_v23  ;;  %937 = vmatprep.subr.bf16.mxu1 %v956_v23 }
  0x33   :  { %912 = vmatpush3.bf16.xpose.msra.mxu0 %v956_v23  ;;  %945 = vmatpush3.bf16.xpose.msra.mxu1 %v956_v23 }
  0x34   :  { %913 = vmatprep.subr.bf16.mxu0 %v957_v26  ;;  %938 = vmatprep.subr.bf16.mxu1 %v957_v26 }
  0x3b   :  { %914 = vmatpush3.bf16.xpose.msra.mxu0 %v957_v26  ;;  %946 = vmatpush3.bf16.xpose.msra.mxu1 %v957_v26 }
  0x42   :  { %916 = vmatmul.mubr.bf16.vlgmr.msra.gmra.mrb[0].mxu0 %v960_v27  ;;  %924 = vmatmul.mubr.bf16.vlgmr.msra.gmra.mrb[0].mxu1 %v961_v28  ;;  %v1292_v28 = vadd.s32 64, %v1163_v40 }
  0x43   :  { %919 = vmatprep.mubr.bf16.mxu0 %v962_v29  ;;  %927 = vmatprep.mubr.bf16.mxu1 %v963_v30 }
  0x4a   :  { %920 = vmatmul.mubr.bf16.gmra.mrb[4].mxu0 %v964_v31  ;;  %928 = vmatmul.mubr.bf16.gmra.mrb[4].mxu1 %v965_v32 }
  0x85   :  { %v446_v33 = vpop.permute.xlu1 %445  ;;  %v440_v37 = vpop.permute.xlu0 %439 }
  0x86   :  { %vm492_vm0 = vcmp.eq.s32.totalorder %v446_v33, %v1173_v44  ;;  %vm490_vm4 = vcmp.eq.s32.totalorder %v440_v37, %v1173_v44 }
  0x87   :  { %vm1203_vm6 = vmand %vm492_vm0, %vm340_vm1 }
  0x88   :  { %vm1233_vm10 = vmand %vm490_vm4, %vm338_vm7  ;;  %vm343_vm4 = vcmp.ne.s32.totalorder %v1250_v11, %v1168_v43 }
  0x89   :  { %v449_v34 = vpop.permute.xlu1 %448  ;;  %v443_v41 = vpop.permute.xlu0 %442 }
  0x8a   :  { %vm493_vm2 = vcmp.eq.s32.totalorder %v449_v34, %v1173_v44  ;;  %vm491_vm5 = vcmp.eq.s32.totalorder %v443_v41, %v1173_v44 }
  0x8b   :  { %vm509_vm8 = vmand %vm493_vm2, %vm341_vm3 }
  0x8c   :  { %vm1245_vm11 = vmand %vm491_vm5, %vm339_vm9 }
  0x8d   :  { %v1157_v35 = vpop.permute.xlu1 %454  ;;  %v1180_v47 = vpop.permute.xlu0 %451 }
  0x8e   :  { %vm495_vm15 = vcmp.eq.s32.totalorder %v1157_v35, %v1173_v44  ;;  %vm494_vm2 = vcmp.eq.s32.totalorder %v1180_v47, %v1173_v44 }
  0x91   :  { %v1159_v36 = vpop.permute.xlu1 %460  ;;  %v458_v9 = vpop.permute.xlu0 %457 }
  0x92   :  { %vm496_vm13 = vcmp.eq.s32.totalorder %v458_v9, %v1173_v44  ;;  %vm497_vm0 = vcmp.eq.s32.totalorder %v1159_v36, %v1173_v44 }
  0x93   :  { %vm512_vm5 = vmand %vm496_vm13, %vm1659_vm12  ;;  %vm354_vm13 = vcmp.lt.s32.totalorder %v1168_v43, 8 }
  0x95   :  { %v1161_v39 = vpop.permute.xlu1 %466 }
  0x99   :  { %v1178_v46 = vpop.permute.xlu1 %472 }
  0x9d   :  { %v1209_v60 = vpop.permute.xlu1 %478 }
  0xa1   :  { %v485_v24 = vpop.permute.xlu1 %484 }
 0x115   :  { %v917_v48 = vpop.f32.mrb[0].mxu0  ;;  %v925_v49 = vpop.f32.mrb[0].mxu1 }
 0x116   :  { %v284_v51 = vmul.f32 14.285714, %v917_v48  ;;  %v1189_v52 = vmul.f32 14.285714, %v925_v49  ;;  %v219_v53 = vpop.f32.mrb[1].mxu0  ;;  %v251_v54 = vpop.f32.mrb[1].mxu1 }
 0x117   :  { %v918_v55 = vpop.f32.mrb[2].mxu0  ;;  %v1194_v56 = vpop.f32.mrb[2].mxu1  ;;  %v282_v61 = vmul.f32 14.285714, %v219_v53  ;;  %v1211_v62 = vmul.f32 14.285714, %v251_v54 }
 0x118   :  { %v393_v57 = vmul.f32 1.442695, %v1189_v52  ;;  %v285_v58 = vmul.f32 14.285714, %v918_v55  ;;  %v377_v0 = vmul.f32 1.442695, %v284_v51 }
 0x119   :  { %v222_v1 = vpop.f32.mrb[3].mxu0  ;;  %v1223_v2 = vpop.f32.mrb[3].mxu1  ;;  %v524_v3 = vsel %vm1203_vm6, %v284_v51, 0.0  ;;  %v389_v5 = vmul.f32 1.442695, %v1211_v62  ;;  %v522_v17 = vsel %vm1233_vm10, %v282_v61, 0.0  ;;  %vm342_vm6 = vcmp.ne.s32.totalorder %v1255_v14, %v1168_v43 }
 0x11a   :  { %v525_v4 = vsel %vm509_vm8, %v285_v58, 0.0  ;;  %966 = vpow2.f32 %v393_v57  ;;  %v283_v6 = vmul.f32 14.285714, %v222_v1  ;;  %705 = vadd.xlane.f32.xlu1 %v524_v3  ;;  %v373_v21 = vmul.f32 1.442695, %v282_v61  ;;  %vm510_vm12 = vmand %vm494_vm2, %vm342_vm6 }
 0x11b   :  { %707 = vadd.xlane.f32.xlu0 %v525_v4  ;;  %968 = vpow2.f32 %v377_v0  ;;  %vm348_vm8 = vcmp.ne.s32.totalorder %v1258_v15, %v1168_v43  ;;  %vm353_vm10 = vcmp.ne.s32.totalorder %v1261_v16, %v1168_v43  ;;  %v379_v33 = vmul.f32 1.442695, %v285_v58  ;;  %vm511_vm2 = vmand %vm495_vm15, %vm343_vm4 }
 0x11c   :  { %970 = vpow2.f32 %v389_v5  ;;  %v523_v23 = vsel %vm1245_vm11, %v283_v6, 0.0  ;;  %v375_v25 = vmul.f32 1.442695, %v283_v6  ;;  %v1297_v34 = vmul.f32 14.285714, %v1194_v56  ;;  %vm513_vm11 = vmand %vm497_vm0, %vm345_vm14 }
 0x11d   :  { %v929_v12 = vpop.f32.mrb[4].mxu1  ;;  %v921_v13 = vpop.f32.mrb[4].mxu0  ;;  %972 = vpow2.f32 %v373_v21  ;;  %vm1324_vm0 = vmand %vm348_vm8, %vm354_vm13  ;;  %vm346_vm15 = vcmp.ne.s32.totalorder %v1292_v28, %v1168_v43  ;;  %v1363_v0 = vmul.f32 14.285714, %v1223_v2 }
 0x11e   :  { %v288_v18 = vmul.f32 14.285714, %v921_v13  ;;  %v235_v19 = vpop.f32.mrb[5].mxu0  ;;  %v1266_v20 = vpop.f32.mrb[5].mxu1  ;;  %701 = vadd.xlane.f32.xlu1 %v522_v17  ;;  %974 = vpow2.f32 %v375_v25  ;;  %v1317_v36 = vmul.f32 14.285714, %v929_v12 }
 0x11f   :  { %v930_v22 = vpop.f32.mrb[6].mxu1  ;;  %703 = vadd.xlane.f32.xlu0 %v523_v23  ;;  %v922_v26 = vpop.f32.mrb[6].mxu0  ;;  %v286_v29 = vmul.f32 14.285714, %v235_v19  ;;  %v395_v53 = vmul.f32 1.442695, %v1297_v34  ;;  %976 = vpow2.f32 %v379_v33 }
 0x120   :  { %v1280_v27 = vpop.f32.mrb[7].mxu1  ;;  %v289_v30 = vmul.f32 14.285714, %v922_v26  ;;  %v238_v31 = vpop.f32.mrb[7].mxu0  ;;  %v528_v32 = vsel %vm512_vm5, %v288_v18, 0.0  ;;  %vm505_vm5 = vcmp.eq.s32.totalorder %v485_v24, %v1173_v44  ;;  %v1394_v12 = vadd.s32 88, %v1163_v40 }
 0x121   :  { %v1307_v37 = vmul.f32 14.285714, %v930_v22  ;;  %v1309_v38 = vmul.f32 14.285714, %v238_v31  ;;  %v385_v49 = vmul.f32 1.442695, %v288_v18  ;;  %v464_v33 = vpop.permute.xlu0 %463 }
 0x122   :  { %713 = vadd.xlane.f32.xlu1 %v528_v32  ;;  %v529_v41 = vsel %vm513_vm11, %v289_v30, 0.0  ;;  %v526_v54 = vsel %vm510_vm12, %v286_v29, 0.0  ;;  %v401_v47 = vmul.f32 1.442695, %v1317_v36  ;;  %vm1341_vm11 = vmand %vm505_vm5, %vm353_vm10  ;;  %v391_v1 = vmul.f32 1.442695, %v1363_v0 }
 0x123   :  { %715 = vadd.xlane.f32.xlu0 %v529_v41  ;;  %v527_v57 = vsel %vm511_vm2, %v1309_v38, 0.0  ;;  %vm1353_vm12 = vmand %vm340_vm1, %vm354_vm13  ;;  %v537_v59 = vsel %vm1341_vm11, %v1307_v37, 0.0  ;;  %978 = vpow2.f32 %v385_v49  ;;  %v1376_v3 = vmul.f32 14.285714, %v1266_v20 }
 0x124   :  { %v967_v48 = vpop.eup %966  ;;  %vm1370_vm1 = vmand %vm346_vm15, %vm354_vm13  ;;  %980 = vpow2.f32 %v395_v53  ;;  %v381_v6 = vmul.f32 1.442695, %v286_v29  ;;  %v387_v10 = vmul.f32 1.442695, %v289_v30  ;;  %v1397_v17 = vadd.s32 112, %v1163_v40 }
 0x125   :  { %v969_v56 = vpop.eup %968  ;;  %v415_v35 = vsel %vm1324_vm0, %v967_v48, 0.0  ;;  %982 = vpow2.f32 %v401_v47  ;;  %vm357_vm5 = vmand %vm338_vm7, %vm354_vm13  ;;  %v397_v7 = vmul.f32 1.442695, %v1376_v3  ;;  %v403_v20 = vmul.f32 1.442695, %v1307_v37  ;;  %v470_v14 = vpop.permute.xlu0 %469 }
 0x126   :  { %709 = vadd.xlane.f32.xlu1 %v526_v54  ;;  %v971_v61 = vpop.eup %970  ;;  %v407_v2 = vsel %vm1353_vm12, %v969_v56, 0.0  ;;  %984 = vpow2.f32 %v391_v1  ;;  %vm358_vm0 = vmand %vm339_vm9, %vm354_vm13  ;;  %vm1674_vm9 = vcmp.ne.s32.totalorder %v1221_v63, %v1168_v43  ;;  %vm349_vm12 = vcmp.ne.s32.totalorder %v1394_v12, %v1168_v43 }
 0x127   :  { %711 = vadd.xlane.f32.xlu0 %v527_v57  ;;  %v413_v4 = vsel %vm1370_vm1, %v971_v61, 0.0  ;;  %v973_v5 = vpop.eup %972  ;;  %986 = vpow2.f32 %v381_v6  ;;  %vm360_vm7 = vmand %vm341_vm3, %vm354_vm13  ;;  %vm352_vm1 = vcmp.ne.s32.totalorder %v1397_v17, %v1168_v43  ;;  %v1424_v63 = vadd.s32 72, %v1163_v40 }
 0x128   :  { %v975_v9 = vpop.eup %974  ;;  %v405_v13 = vsel %vm357_vm5, %v973_v5, 0.0  ;;  %988 = vpow2.f32 %v397_v7  ;;  %vm363_vm2 = vmand %vm1674_vm9, %vm354_vm13  ;;  %v383_v26 = vmul.f32 1.442695, %v1309_v38  ;;  %v312_v31 = vadd.s32 96, %v1163_v40 }
 0x129   :  { %v977_v18 = vpop.eup %976  ;;  %v406_v19 = vsel %vm358_vm0, %v975_v9, 0.0  ;;  %990 = vpow2.f32 %v387_v10  ;;  %vm1417_vm3 = vmand %vm349_vm12, %vm354_vm13  ;;  %vm347_vm0 = vcmp.ne.s32.totalorder %v1424_v63, %v1168_v43  ;;  %v1444_v41 = vmul.f32 14.285714, %v1280_v27  ;;  %v476_v58 = vpop.permute.xlu0 %475  ;;  %v735_v9 = vld [vmem:[%s1657_s4 + $0x10] sm:$0xff] }
 0x12a   :  { %673 = vadd.xlane.f32.xlu1 %v415_v35  ;;  %v408_v22 = vsel %vm360_vm7, %v977_v18, 0.0  ;;  %vm1431_vm5 = vmand %vm352_vm1, %vm354_vm13  ;;  %992 = vpow2.f32 %v403_v20  ;;  %v313_v57 = vadd.s32 104, %v1163_v40  ;;  %vm815_vm11 = vcmp.gt.f32.partialorder %v735_v9, 0.0 }
 0x12b   :  { %657 = vadd.xlane.f32.xlu0 %v407_v2  ;;  %vm366_vm7 = vmand %vm347_vm0, %vm354_vm13  ;;  %994 = vpow2.f32 %v383_v26  ;;  %v399_v48 = vmul.f32 1.442695, %v1444_v41 }
 0x12c   :  { %vm361_vm9 = vmand %vm342_vm6, %vm354_vm13  ;;  %vm498_vm6 = vcmp.eq.s32.totalorder %v464_v33, %v1173_v44 }
 0x12d   :  { %v979_v50 = vpop.eup %978  ;;  %996 = vpow2.f32 %v399_v48 }
 0x12e   :  { %669 = vadd.xlane.f32.xlu1 %v413_v4  ;;  %v981_v21 = vpop.eup %980  ;;  %v411_v25 = vsel %vm363_vm2, %v979_v50, 0.0  ;;  %vm364_vm2 = vmand %vm345_vm14, %vm354_vm13 }
 0x12f   :  { %653 = vadd.xlane.f32.xlu0 %v405_v13  ;;  %v983_v23 = vpop.eup %982  ;;  %v416_v29 = vsel %vm1417_vm3, %v981_v21, 0.0  ;;  %vm350_vm3 = vcmp.ne.s32.totalorder %v312_v31, %v1168_v43  ;;  %vm372_vm14 = vmand %vm353_vm10, %vm354_vm13 }
 0x130   :  { %v419_v30 = vsel %vm1431_vm5, %v983_v23, 0.0  ;;  %v985_v32 = vpop.eup %984  ;;  %vm369_vm5 = vmand %vm350_vm3, %vm354_vm13 }
 0x131   :  { %v987_v38 = vpop.eup %986  ;;  %v414_v49 = vsel %vm366_vm7, %v985_v32, 0.0  ;;  %vm514_vm7 = vmand %vm498_vm6, %vm346_vm15  ;;  %vm351_vm15 = vcmp.ne.s32.totalorder %v313_v57, %v1168_v43  ;;  %vm502_vm6 = vcmp.eq.s32.totalorder %v476_v58, %v1173_v44 }
 0x132   :  { %655 = vadd.xlane.f32.xlu1 %v406_v19  ;;  %v989_v27 = vpop.eup %988  ;;  %v409_v53 = vsel %vm361_vm9, %v987_v38, 0.0  ;;  %vm500_vm9 = vcmp.eq.s32.totalorder %v470_v14, %v1173_v44  ;;  %v530_v16 = vsel %vm514_vm7, %v1211_v62, 0.0  ;;  %v482_v62 = vpop.permute.xlu0 %481  ;;  %vm501_vm7 = vcmp.eq.s32.totalorder %v1178_v46, %v1173_v44  ;;  %v733_v19 = vld [vmem:[%s1657_s4] sm:$0xff] }
 0x133   :  { %659 = vadd.xlane.f32.xlu0 %v408_v22  ;;  %v991_v51 = vpop.eup %990  ;;  %v417_v47 = vsel %vm369_vm5, %v989_v27, 0.0  ;;  %vm516_vm10 = vmand %vm500_vm9, %vm348_vm8  ;;  %v739_v27 = vld [vmem:[%s1657_s4 + $0x30] sm:$0xff] }
 0x134   :  { %v412_v54 = vsel %vm364_vm2, %v991_v51, 0.0  ;;  %v993_v56 = vpop.eup %992  ;;  %vm362_vm2 = vmand %vm343_vm4, %vm354_vm13  ;;  %v532_v11 = vsel %vm516_vm10, %v1189_v52, 0.0  ;;  %vm499_vm4 = vcmp.eq.s32.totalorder %v1161_v39, %v1173_v44  ;;  %vm814_vm10 = vcmp.gt.f32.partialorder %v734_v45, 0.0 }
 0x135   :  { %v420_v8 = vsel %vm372_vm14, %v993_v56, 0.0  ;;  %v995_v35 = vpop.eup %994  ;;  %vm370_vm5 = vmand %vm351_vm15, %vm354_vm13  ;;  %vm504_vm14 = vcmp.eq.s32.totalorder %v482_v62, %v1173_v44  ;;  %v741_v56 = vld [vmem:[%s1657_s4 + $0x40] sm:$0xff] }
 0x136   :  { %665 = vadd.xlane.f32.xlu1 %v411_v25  ;;  %v410_v28 = vsel %vm362_vm2, %v995_v35, 0.0  ;;  %vm518_vm8 = vmand %vm502_vm6, %vm350_vm3  ;;  %vm821_vm6 = vcmp.gt.f32.partialorder %v741_v56, 0.0 }
 0x137   :  { %675 = vadd.xlane.f32.xlu0 %v416_v29  ;;  %v997_v40 = vpop.eup %996  ;;  %v534_v61 = vsel %vm518_vm8, %v1376_v3, 0.0  ;;  %vm515_vm13 = vmand %vm499_vm4, %vm347_vm0  ;;  %vm503_vm0 = vcmp.eq.s32.totalorder %v1209_v60, %v1173_v44 }
 0x138   :  { %v418_v15 = vsel %vm370_vm5, %v997_v40, 0.0  ;;  %v531_v52 = vsel %vm515_vm13, %v1363_v0, 0.0  ;;  %vm520_vm9 = vmand %vm504_vm14, %vm352_vm1  ;;  %vm813_vm1 = vcmp.gt.f32.partialorder %v733_v19, 0.0  ;;  %vm819_vm5 = vcmp.gt.f32.partialorder %v739_v27, 0.0 }
 0x139   :  { %v536_v39 = vsel %vm520_vm9, %v1317_v36, 0.0  ;;  %vm517_vm3 = vmand %vm501_vm7, %vm349_vm12  ;;  %vm845_vm12 = vcmask 7168  }
 0x13a   :  { %681 = vadd.xlane.f32.xlu1 %v419_v30  ;;  %v533_v42 = vsel %vm517_vm3, %v1297_v34, 0.0  ;;  %vm519_vm2 = vmand %vm503_vm0, %vm351_vm15  ;;  %v736_v30 = vld [vmem:[%s1657_s4 + $0x18] sm:$0xff] }
 0x13b   :  { %671 = vadd.xlane.f32.xlu0 %v414_v49  ;;  %v535_v46 = vsel %vm519_vm2, %v1444_v41, 0.0  ;;  %vm816_vm15 = vcmp.gt.f32.partialorder %v736_v30, 0.0 }
 0x13e   :  { %661 = vadd.xlane.f32.xlu1 %v409_v53 }
 0x13f   :  { %667 = vadd.xlane.f32.xlu0 %v412_v54 }
 0x142   :  { %677 = vadd.xlane.f32.xlu1 %v417_v47 }
 0x143   :  { %683 = vadd.xlane.f32.xlu0 %v420_v8 }
 0x146   :  { %717 = vadd.xlane.f32.xlu1 %v530_v16 }
 0x147   :  { %663 = vadd.xlane.f32.xlu0 %v410_v28 }
 0x14a   :  { %721 = vadd.xlane.f32.xlu1 %v532_v11 }
 0x14b   :  { %679 = vadd.xlane.f32.xlu0 %v418_v15  ;;  %v743_v15 = vld [vmem:[%s1657_s4 + $0x50] sm:$0xff] }
 0x14c   :  { %vm823_vm4 = vcmp.gt.f32.partialorder %v743_v15, 0.0 }
 0x14e   :  { %725 = vadd.xlane.f32.xlu1 %v534_v61 }
 0x14f   :  { %719 = vadd.xlane.f32.xlu0 %v531_v52 }
 0x152   :  { %729 = vadd.xlane.f32.xlu1 %v536_v39 }
 0x153   :  { %723 = vadd.xlane.f32.xlu0 %v533_v42 }
 0x157   :  { %727 = vadd.xlane.f32.xlu0 %v535_v46 }
 0x15b   :  { %731 = vadd.xlane.f32.xlu0 %v537_v59 }
 0x1a7   :  { %v706_v36 = vpop.xlane.xlu1 %705 }
 0x1a8   :  { %v1523_v0 = vpop.xlane.xlu0 %707 }
 0x1ab   :  { %v702_v1 = vpop.xlane.xlu1 %701 }
 0x1ac   :  { %v1525_v3 = vpop.xlane.xlu0 %703 }
 0x1af   :  { %v1527_v44 = vpop.xlane.xlu1 %713 }
 0x1b0   :  { %v1529_v60 = vpop.xlane.xlu0 %715 }
 0x1b3   :  { %v1531_v43 = vpop.xlane.xlu1 %709 }
 0x1b4   :  { %v1533_v34 = vpop.xlane.xlu0 %711 }
 0x1b7   :  { %v674_v2 = vpop.xlane.xlu1 %673 }
 0x1b8   :  { %v658_v4 = vpop.xlane.xlu0 %657 }
 0x1b9   :  { %998 = vlog2.f32 %v658_v4 }
 0x1bb   :  { %v670_v55 = vpop.xlane.xlu1 %669 }
 0x1bc   :  { %v654_v37 = vpop.xlane.xlu0 %653 }
 0x1bd   :  { %1000 = vlog2.f32 %v654_v37 }
 0x1bf   :  { %v656_v59 = vpop.xlane.xlu1 %655 }
 0x1c0   :  { %1002 = vlog2.f32 %v656_v59  ;;  %v660_v5 = vpop.xlane.xlu0 %659 }
 0x1c1   :  { %1004 = vlog2.f32 %v670_v55 }
 0x1c2   :  { %1006 = vlog2.f32 %v660_v5  ;;  %v740_v5 = vld [vmem:[%s1657_s4 + $0x38] sm:$0xff] }
 0x1c3   :  { %v666_v6 = vpop.xlane.xlu1 %665  ;;  %v999_v7 = vpop.eup %998  ;;  %vm820_vm14 = vcmp.gt.f32.partialorder %v740_v5, 0.0 }
 0x1c4   :  { %1008 = vlog2.f32 %v666_v6  ;;  %v754_v10 = vmul.f32 0.6931472, %v999_v7  ;;  %v676_v12 = vpop.xlane.xlu0 %675 }
 0x1c5   :  { %1010 = vlog2.f32 %v674_v2 }
 0x1c6   :  { %v783_v13 = vmul.f32 %v754_v10, %v735_v9 }
 0x1c7   :  { %v682_v17 = vpop.xlane.xlu1 %681  ;;  %v1001_v18 = vpop.eup %1000 }
 0x1c8   :  { %v799_v50 = vsub.f32 %v783_v13, %v706_v36  ;;  %v750_v20 = vmul.f32 0.6931472, %v1001_v18  ;;  %v672_v21 = vpop.xlane.xlu0 %671  ;;  %1012 = vlog2.f32 %v682_v17  ;;  %v747_v13 = vld [vmem:[%s1657_s4 + $0x70] sm:$0xff] }
 0x1c9   :  { %1014 = vlog2.f32 %v672_v21  ;;  %vm827_vm9 = vcmp.gt.f32.partialorder %v747_v13, 0.0 }
 0x1ca   :  { %v1003_v22 = vpop.eup %1002  ;;  %v831_v23 = vsel %vm815_vm11, %v799_v50, 0.0  ;;  %v781_v24 = vmul.f32 %v750_v20, %v733_v19  ;;  %v745_v19 = vld [vmem:[%s1657_s4 + $0x60] sm:$0xff] }
 0x1cb   :  { %v1005_v63 = vpop.eup %1004  ;;  %v752_v25 = vmul.f32 0.6931472, %v1003_v22  ;;  %v662_v26 = vpop.xlane.xlu1 %661  ;;  %848 = vst.msk [vmem:[%s1658_s5 + $0x10] sm:$0xff] %vm845_vm12, %v831_v23  ;;  %vm825_vm7 = vcmp.gt.f32.partialorder %v745_v19, 0.0 }
 0x1cc   :  { %v1007_v29 = vpop.eup %1006  ;;  %1016 = vlog2.f32 %v662_v26  ;;  %v797_v31 = vsub.f32 %v781_v24, %v702_v1  ;;  %v668_v41 = vpop.xlane.xlu0 %667  ;;  %v766_v48 = vmul.f32 0.6931472, %v1005_v63 }
 0x1cd   :  { %v782_v32 = vmul.f32 %v752_v25, %v734_v45  ;;  %v756_v33 = vmul.f32 0.6931472, %v1007_v29  ;;  %1018 = vlog2.f32 %v676_v12  ;;  %v742_v12 = vld [vmem:[%s1657_s4 + $0x48] sm:$0xff] }
 0x1ce   :  { %v1009_v38 = vpop.eup %1008  ;;  %1020 = vlog2.f32 %v668_v41  ;;  %v829_v51 = vsel %vm813_vm1, %v797_v31, 0.0  ;;  %v789_v28 = vmul.f32 %v766_v48, %v741_v56  ;;  %vm822_vm13 = vcmp.gt.f32.partialorder %v742_v12, 0.0 }
 0x1cf   :  { %v1011_v49 = vpop.eup %1010  ;;  %v798_v53 = vsub.f32 %v782_v32, %v1525_v3  ;;  %v784_v14 = vmul.f32 %v756_v33, %v736_v30  ;;  %v762_v54 = vmul.f32 0.6931472, %v1009_v38  ;;  %v678_v47 = vpop.xlane.xlu1 %677  ;;  %846 = vst.msk [vmem:[%s1658_s5] sm:$0xff] %vm845_vm12, %v829_v51 }
 0x1d0   :  { %1022 = vlog2.f32 %v678_v47  ;;  %v684_v58 = vpop.xlane.xlu0 %683  ;;  %v770_v16 = vmul.f32 0.6931472, %v1011_v49 }
 0x1d1   :  { %v830_v8 = vsel %vm814_vm10, %v798_v53, 0.0  ;;  %v800_v57 = vsub.f32 %v784_v14, %v1523_v0  ;;  %v787_v35 = vmul.f32 %v762_v54, %v739_v27  ;;  %v737_v0 = vld [vmem:[%s1657_s4 + $0x20] sm:$0xff] }
 0x1d2   :  { %847 = vst.msk [vmem:[%s1658_s5 + $0x8] sm:$0xff] %vm845_vm12, %v830_v8  ;;  %v1013_v61 = vpop.eup %1012  ;;  %v791_v3 = vmul.f32 %v770_v16, %v743_v15  ;;  %vm817_vm8 = vcmp.gt.f32.partialorder %v737_v0, 0.0 }
 0x1d3   :  { %v832_v40 = vsel %vm816_vm15, %v800_v57, 0.0  ;;  %v803_v11 = vsub.f32 %v787_v35, %v1527_v44  ;;  %v718_v62 = vpop.xlane.xlu1 %717  ;;  %v1015_v39 = vpop.eup %1014  ;;  %v778_v37 = vmul.f32 0.6931472, %v1013_v61 }
 0x1d4   :  { %849 = vst.msk [vmem:[%s1658_s5 + $0x18] sm:$0xff] %vm845_vm12, %v832_v40  ;;  %v805_v52 = vsub.f32 %v789_v28, %v718_v62  ;;  %v664_v46 = vpop.xlane.xlu0 %663  ;;  %v768_v59 = vmul.f32 0.6931472, %v1015_v39 }
 0x1d5   :  { %v835_v42 = vsel %vm819_vm5, %v803_v11, 0.0  ;;  %1024 = vlog2.f32 %v664_v46  ;;  %v795_v23 = vmul.f32 %v778_v37, %v747_v13  ;;  %v748_v11 = vld [vmem:[%s1657_s4 + $0x78] sm:$0xff] }
 0x1d6   :  { %v1017_v36 = vpop.eup %1016  ;;  %852 = vst.msk [vmem:[%s1658_s5 + $0x30] sm:$0xff] %vm845_vm12, %v835_v42  ;;  %v837_v1 = vsel %vm821_vm6, %v805_v52, 0.0  ;;  %1026 = vlog2.f32 %v684_v58  ;;  %v790_v63 = vmul.f32 %v768_v59, %v742_v12  ;;  %v746_v58 = vld [vmem:[%s1657_s4 + $0x68] sm:$0xff]  ;;  %vm828_vm11 = vcmp.gt.f32.partialorder %v748_v11, 0.0 }
 0x1d7   :  { %v1019_v44 = vpop.eup %1018  ;;  %v758_v2 = vmul.f32 0.6931472, %v1017_v36  ;;  %854 = vst.msk [vmem:[%s1658_s5 + $0x40] sm:$0xff] %vm845_vm12, %v837_v1  ;;  %v722_v4 = vpop.xlane.xlu1 %721  ;;  %vm826_vm2 = vcmp.gt.f32.partialorder %v746_v58, 0.0 }
 0x1d8   :  { %v1021_v55 = vpop.eup %1020  ;;  %v807_v6 = vsub.f32 %v791_v3, %v722_v4  ;;  %v680_v10 = vpop.xlane.xlu0 %679  ;;  %v772_v45 = vmul.f32 0.6931472, %v1019_v44 }
 0x1d9   :  { %v785_v7 = vmul.f32 %v758_v2, %v737_v0  ;;  %v764_v9 = vmul.f32 0.6931472, %v1021_v55  ;;  %1028 = vlog2.f32 %v680_v10 }
 0x1da   :  { %v1023_v17 = vpop.eup %1022  ;;  %v839_v18 = vsel %vm823_vm4, %v807_v6, 0.0 }
 0x1db   :  { %v801_v50 = vsub.f32 %v785_v7, %v1531_v43  ;;  %v788_v20 = vmul.f32 %v764_v9, %v740_v5  ;;  %v774_v21 = vmul.f32 0.6931472, %v1023_v17  ;;  %856 = vst.msk [vmem:[%s1658_s5 + $0x50] sm:$0xff] %vm845_vm12, %v839_v18  ;;  %v726_v22 = vpop.xlane.xlu1 %725  ;;  %v744_v43 = vld [vmem:[%s1657_s4 + $0x58] sm:$0xff] }
 0x1dc   :  { %v720_v29 = vpop.xlane.xlu0 %719  ;;  %v792_v27 = vmul.f32 %v772_v45, %v744_v43  ;;  %vm824_vm3 = vcmp.gt.f32.partialorder %v744_v43, 0.0 }
 0x1dd   :  { %v833_v24 = vsel %vm817_vm8, %v801_v50, 0.0  ;;  %v804_v25 = vsub.f32 %v788_v20, %v1529_v60  ;;  %v793_v26 = vmul.f32 %v774_v21, %v745_v19  ;;  %v806_v30 = vsub.f32 %v790_v63, %v720_v29  ;;  %v738_v60 = vld [vmem:[%s1657_s4 + $0x28] sm:$0xff] }
 0x1de   :  { %850 = vst.msk [vmem:[%s1658_s5 + $0x20] sm:$0xff] %vm845_vm12, %v833_v24  ;;  %vm818_vm0 = vcmp.gt.f32.partialorder %v738_v60, 0.0 }
 0x1df   :  { %v836_v31 = vsel %vm820_vm14, %v804_v25, 0.0  ;;  %v809_v32 = vsub.f32 %v793_v26, %v726_v22  ;;  %v730_v33 = vpop.xlane.xlu1 %729  ;;  %v1025_v41 = vpop.eup %1024  ;;  %v838_v38 = vsel %vm822_vm13, %v806_v30, 0.0 }
 0x1e0   :  { %853 = vst.msk [vmem:[%s1658_s5 + $0x38] sm:$0xff] %vm845_vm12, %v836_v31  ;;  %v811_v48 = vsub.f32 %v795_v23, %v730_v33  ;;  %v1027_v49 = vpop.eup %1026  ;;  %v760_v51 = vmul.f32 0.6931472, %v1025_v41  ;;  %855 = vst.msk [vmem:[%s1658_s5 + $0x48] sm:$0xff] %vm845_vm12, %v838_v38  ;;  %v724_v14 = vpop.xlane.xlu0 %723 }
 0x1e1   :  { %v841_v53 = vsel %vm825_vm7, %v809_v32, 0.0  ;;  %v808_v47 = vsub.f32 %v792_v27, %v724_v14  ;;  %v780_v57 = vmul.f32 0.6931472, %v1027_v49 }
 0x1e2   :  { %858 = vst.msk [vmem:[%s1658_s5 + $0x60] sm:$0xff] %vm845_vm12, %v841_v53  ;;  %v843_v54 = vsel %vm827_vm9, %v811_v48, 0.0  ;;  %v786_v56 = vmul.f32 %v760_v51, %v738_v60 }
 0x1e3   :  { %860 = vst.msk [vmem:[%s1658_s5 + $0x70] sm:$0xff] %vm845_vm12, %v843_v54  ;;  %v1029_v8 = vpop.eup %1028  ;;  %v840_v35 = vsel %vm824_vm3, %v808_v47, 0.0 }
 0x1e4   :  { %v802_v16 = vsub.f32 %v786_v56, %v1533_v34  ;;  %v776_v28 = vmul.f32 0.6931472, %v1029_v8  ;;  %857 = vst.msk [vmem:[%s1658_s5 + $0x58] sm:$0xff] %vm845_vm12, %v840_v35  ;;  %v728_v40 = vpop.xlane.xlu0 %727  ;;  %v796_v34 = vmul.f32 %v780_v57, %v748_v11 }
 0x1e6   :  { %v834_v62 = vsel %vm818_vm0, %v802_v16, 0.0  ;;  %v794_v15 = vmul.f32 %v776_v28, %v746_v58 }
 0x1e7   :  { %851 = vst.msk [vmem:[%s1658_s5 + $0x28] sm:$0xff] %vm845_vm12, %v834_v62 }
 0x1e8   :  { %v810_v61 = vsub.f32 %v794_v15, %v728_v40  ;;  %v732_v52 = vpop.xlane.xlu0 %731 }
 0x1e9   :  { %v812_v39 = vsub.f32 %v796_v34, %v732_v52 }
 0x1ea   :  { %v842_v42 = vsel %vm826_vm2, %v810_v61, 0.0 }
 0x1eb   :  { %859 = vst.msk [vmem:[%s1658_s5 + $0x68] sm:$0xff] %vm845_vm12, %v842_v42  ;;  %v844_v46 = vsel %vm828_vm11, %v812_v39, 0.0 }
 0x1ec   :  { %861 = vst.msk [vmem:[%s1658_s5 + $0x78] sm:$0xff] %vm845_vm12, %v844_v46 }

</bundles_post_ra>
